<compile_context>
chip_gen: v7x
topology: tpu7x:2x2x1
jax: 0.10.0
libtpu: 0.0.40
codegen_flags: <defaults>
</compile_context>

<pallas_src>
import functools

import jax
import jax.numpy as jnp
import numpy as np
from jax.experimental import pallas as pl
from jax.experimental.pallas import tpu as pltpu


def _mlp7_kernel(x_ref,
                 w1, b1, w2, b2, w3, b3, w4, b4, w5, b5, w6, b6, w7, b7,
                 o_ref, *, act_dtype):
    """Fused forward for one batch tile: 6x (matmul+bias+tanh) + matmul+bias."""
    h = x_ref[...]
    for w_ref, b_ref in ((w1, b1), (w2, b2), (w3, b3),
                         (w4, b4), (w5, b5), (w6, b6)):
        acc = jnp.dot(h.astype(w_ref.dtype), w_ref[...],
                      preferred_element_type=jnp.float32)
        # bf16 tanh on v6e/v7x (bf16 EUP) feeds the next MXU op directly;
        # f32 tanh on v5e / in the full-precision path.
        h = jnp.tanh((acc + b_ref[...]).astype(act_dtype))
    out = jnp.dot(h.astype(w7.dtype), w7[...],
                  preferred_element_type=jnp.float32) + b7[...]
    o_ref[...] = out.astype(o_ref.dtype)


def _round_up(n, m):
    return ((n + m - 1) // m) * m


def _device_kind():
    try:
        return str(jax.devices()[0].device_kind).lower()
    except Exception:
        return ""


def _num_tensorcores():
    """Best-effort TensorCores-per-JAX-device (v5e/v6e: 1, v7x: 2)."""
    try:
        dev = jax.devices()[0]
    except Exception:
        return 1
    n = getattr(dev, "num_cores", None)
    if isinstance(n, int) and n > 0:
        return n
    kind = str(getattr(dev, "device_kind", "")).lower()
    return 2 if "7" in kind else 1


def _pick_batch_tile(B, num_cores):
    """Sublane-friendly (multiple-of-8) batch tile.

    This kernel is per-grid-step-overhead bound (~0.35 us/step vs ~0.1 us of
    MXU/EUP work at these widths), so fewer and bigger steps win -- except on
    v7x where the grid must have >= 2 steps so both TensorCores get work.
    """
    B8 = _round_up(max(B, 8), 8)
    if num_cores <= 1:
        # v5e/v6e: sequential grid -> one step for anything that fits easily.
        return B8 if B8 <= 2048 else 2048
    # v7x (2 TCs): several decent-sized tiles per core.
    if B8 >= 8192:
        return 2048
    if B8 >= 4096:
        return 1024
    if B8 >= 1024:
        return 512
    if B8 >= 16:
        return _round_up(B8 // 2, 8)
    return 8


def batch_net_6_forward(x, params, *, batch_tile=None,
                        compute_dtype=jnp.bfloat16, act_dtype=None):
    """x: [B, in_dim] float32.  params: list of 7 (W_t, b) with W_t shaped (in, out).

    Returns [B, out_dim] float32.
    """
    B, in_dim = x.shape
    out_dim = params[-1][0].shape[1]

    num_cores = _num_tensorcores()
    kind = _device_kind()

    # --- batch tiling (pad batch to a multiple of the tile) -----------------
    tile = batch_tile if batch_tile is not None else _pick_batch_tile(B, num_cores)
    Bp = _round_up(B, tile)
    if Bp != B:
        x = jnp.pad(x, ((0, Bp - B), (0, 0)))

    # --- activation (tanh) dtype --------------------------------------------
    if act_dtype is None:
        bf16_compute = np.dtype(compute_dtype) == np.dtype(jnp.bfloat16)
        # bf16 EUP exists on v6e/v7x; keep f32 tanh on v5e and in f32 mode.
        act_dtype = jnp.bfloat16 if (bf16_compute and "v5" not in kind) else jnp.float32

    # --- cast matmul operands (weights + input) to the compute dtype --------
    # NOTE: if accuracy ever needs tightening, keep layer-1/layer-7 operands
    # in f32; accumulation is always f32 via preferred_element_type.
    x_in = x.astype(compute_dtype)
    flat_params = []
    in_specs = [pl.BlockSpec((tile, in_dim), lambda i: (i, 0))]
    for (w, b) in params:
        w_c = w.astype(compute_dtype)
        b_c = b.astype(jnp.float32)          # biases / accumulation stay f32
        in_specs.append(pl.BlockSpec(w_c.shape, lambda i: (0, 0)))
        in_specs.append(pl.BlockSpec(b_c.shape, lambda i: (0, 0)))
        flat_params += [w_c, b_c]

    # Output keeps its true feature width (block last dim == full array dim is
    # legal); avoids the 8x f32 lane-padding writeback inflation.
    out_specs = pl.BlockSpec((tile, out_dim), lambda i: (i, 0))

    # --- advisory cost estimate ----------------------------------------------
    flops = 2 * Bp * sum(int(w.shape[0]) * int(w.shape[1]) for w, _ in params)
    transcendentals = Bp * sum(int(w.shape[1]) for w, _ in params[:-1])
    w_bytes = sum(w.size * np.dtype(compute_dtype).itemsize + b.size * 4
                  for w, b in params)
    bytes_accessed = (Bp * in_dim * np.dtype(compute_dtype).itemsize
                      + w_bytes + Bp * out_dim * 4)
    cost = pl.CostEstimate(flops=flops, transcendentals=transcendentals,
                           bytes_accessed=bytes_accessed)

    out = pl.pallas_call(
        functools.partial(_mlp7_kernel, act_dtype=act_dtype),
        out_shape=jax.ShapeDtypeStruct((Bp, out_dim), jnp.float32),
        grid_spec=pltpu.PrefetchScalarGridSpec(
            num_scalar_prefetch=0,
            grid=(Bp // tile,),
            in_specs=in_specs,
            out_specs=out_specs,
        ),
        compiler_params=pltpu.CompilerParams(
            dimension_semantics=("parallel",)),
        cost_estimate=cost,
    )(x_in, *flat_params)

    return out[:B, :]


def init_params(key, dims):
    """PyTorch-Linear-style init (U[-1/sqrt(fan_in), 1/sqrt(fan_in)]).

    Returns list of (W_t, b) where W_t is (in, out) and b is (1, out)."""
    params = []
    for i in range(len(dims) - 1):
        fan_in, fan_out = dims[i], dims[i + 1]
        key, kw, kb = jax.random.split(key, 3)
        bound = 1.0 / jnp.sqrt(fan_in)
        w = jax.random.uniform(kw, (fan_in, fan_out), jnp.float32, -bound, bound)
        b = jax.random.uniform(kb, (1, fan_out), jnp.float32, -bound, bound)
        params.append((w, b))
    return params


def reference_forward(x, params):
    h = x
    for i, (w, b) in enumerate(params):
        h = h @ w + b
        if i < len(params) - 1:
            h = jnp.tanh(h)
    return h


if __name__ == "__main__":
    key = jax.random.PRNGKey(0)
    # in_dim, n_hidden_1..6, out_dim
    dims = [32, 64, 64, 64, 64, 64, 64, 16]
    B = 16

    key, kx = jax.random.split(key)
    x = jax.random.normal(kx, (B, dims[0]), jnp.float32)
    params = init_params(key, dims)

    ref = reference_forward(x, params)

    # Default fast path: bf16 MXU operands (+ bf16 tanh on v6e/v7x), f32 acc.
    out_bf16 = jax.block_until_ready(batch_net_6_forward(x, params))
    assert out_bf16.shape == (B, dims[-1])
    assert jnp.allclose(out_bf16, ref, atol=5e-2, rtol=5e-2), \
        "bf16-operand kernel mismatch vs pure-JAX reference"

    # Full-precision path: tight correctness check.
    out_f32 = jax.block_until_ready(
        batch_net_6_forward(x, params, compute_dtype=jnp.float32))
    assert out_f32.shape == (B, dims[-1])
    assert jnp.allclose(out_f32, ref, atol=1e-5, rtol=1e-5), \
        "f32 kernel mismatch vs pure-JAX reference"

    # Non-multiple-of-8 batch: exercises the batch-padding / slicing path.
    key, kx2 = jax.random.split(key)
    x2 = jax.random.normal(kx2, (20, dims[0]), jnp.float32)
    out2 = jax.block_until_ready(batch_net_6_forward(x2, params))
    assert out2.shape == (20, dims[-1])
    assert jnp.allclose(out2, reference_forward(x2, params),
                        atol=5e-2, rtol=5e-2), \
        "padded-batch kernel mismatch vs pure-JAX reference"

    print("KERNEL_OK")
</pallas_src>

<mosaic_0001>
module attributes {stable_mosaic.version = 11 : i64} {
  func.func @_mlp7_kernel(%arg0: i32, %arg1: memref<16x32xbf16, #tpu.memory_space<vmem>>, %arg2: memref<32x64xbf16, #tpu.memory_space<vmem>>, %arg3: memref<1x64xf32, #tpu.memory_space<vmem>>, %arg4: memref<64x64xbf16, #tpu.memory_space<vmem>>, %arg5: memref<1x64xf32, #tpu.memory_space<vmem>>, %arg6: memref<64x64xbf16, #tpu.memory_space<vmem>>, %arg7: memref<1x64xf32, #tpu.memory_space<vmem>>, %arg8: memref<64x64xbf16, #tpu.memory_space<vmem>>, %arg9: memref<1x64xf32, #tpu.memory_space<vmem>>, %arg10: memref<64x64xbf16, #tpu.memory_space<vmem>>, %arg11: memref<1x64xf32, #tpu.memory_space<vmem>>, %arg12: memref<64x64xbf16, #tpu.memory_space<vmem>>, %arg13: memref<1x64xf32, #tpu.memory_space<vmem>>, %arg14: memref<64x16xbf16, #tpu.memory_space<vmem>>, %arg15: memref<1x16xf32, #tpu.memory_space<vmem>>, %arg16: memref<16x16xf32, #tpu.memory_space<vmem>>) attributes {dimension_semantics = [#tpu.dimension_semantics<parallel>], iteration_bounds = array<i64: 1>, scalar_prefetch = 0 : i64, scratch_operands = 0 : i64, tpu.core_type = #tpu.core_type<tc>, window_params = [{transform_indices = @transform_0, window_bounds = array<i64: 16, 32>}, {pipeline_mode = #tpu.pipeline_mode<synchronous>, transform_indices = @transform_1, window_bounds = array<i64: 32, 64>}, {pipeline_mode = #tpu.pipeline_mode<synchronous>, transform_indices = @transform_2, window_bounds = array<i64: 1, 64>}, {pipeline_mode = #tpu.pipeline_mode<synchronous>, transform_indices = @transform_3, window_bounds = array<i64: 64, 64>}, {pipeline_mode = #tpu.pipeline_mode<synchronous>, transform_indices = @transform_4, window_bounds = array<i64: 1, 64>}, {pipeline_mode = #tpu.pipeline_mode<synchronous>, transform_indices = @transform_5, window_bounds = array<i64: 64, 64>}, {pipeline_mode = #tpu.pipeline_mode<synchronous>, transform_indices = @transform_6, window_bounds = array<i64: 1, 64>}, {pipeline_mode = #tpu.pipeline_mode<synchronous>, transform_indices = @transform_7, window_bounds = array<i64: 64, 64>}, {pipeline_mode = #tpu.pipeline_mode<synchronous>, transform_indices = @transform_8, window_bounds = array<i64: 1, 64>}, {pipeline_mode = #tpu.pipeline_mode<synchronous>, transform_indices = @transform_9, window_bounds = array<i64: 64, 64>}, {pipeline_mode = #tpu.pipeline_mode<synchronous>, transform_indices = @transform_10, window_bounds = array<i64: 1, 64>}, {pipeline_mode = #tpu.pipeline_mode<synchronous>, transform_indices = @transform_11, window_bounds = array<i64: 64, 64>}, {pipeline_mode = #tpu.pipeline_mode<synchronous>, transform_indices = @transform_12, window_bounds = array<i64: 1, 64>}, {pipeline_mode = #tpu.pipeline_mode<synchronous>, transform_indices = @transform_13, window_bounds = array<i64: 64, 16>}, {pipeline_mode = #tpu.pipeline_mode<synchronous>, transform_indices = @transform_14, window_bounds = array<i64: 1, 16>}, {transform_indices = @transform_15, window_bounds = array<i64: 16, 16>}]} {
    %c0 = arith.constant 0 : index
    %c0_0 = arith.constant 0 : index
    %0 = vector.load %arg1[%c0, %c0_0] : memref<16x32xbf16, #tpu.memory_space<vmem>>, vector<16x32xbf16>
    %c0_1 = arith.constant 0 : index
    %c0_2 = arith.constant 0 : index
    %1 = vector.load %arg2[%c0_1, %c0_2] : memref<32x64xbf16, #tpu.memory_space<vmem>>, vector<32x64xbf16>
    %cst = arith.constant dense<0.000000e+00> : vector<16x64xf32>
    %2 = tpu.matmul %0, %1, %cst {dimension_numbers = #tpu.dot_dimension_numbers<[1], [0], [0], [1], [0, 0, 1, 1], [], []>} : vector<16x32xbf16>, vector<32x64xbf16>, vector<16x64xf32> -> vector<16x64xf32>
    %c0_3 = arith.constant 0 : index
    %c0_4 = arith.constant 0 : index
    %3 = vector.load %arg3[%c0_3, %c0_4] : memref<1x64xf32, #tpu.memory_space<vmem>>, vector<1x64xf32>
    %4 = vector.broadcast %3 : vector<1x64xf32> to vector<16x64xf32>
    %5 = arith.addf %2, %4 : vector<16x64xf32>
    %6 = arith.truncf %5 : vector<16x64xf32> to vector<16x64xbf16>
    %7 = math.tanh %6 : vector<16x64xbf16>
    %c0_5 = arith.constant 0 : index
    %c0_6 = arith.constant 0 : index
    %8 = vector.load %arg4[%c0_5, %c0_6] : memref<64x64xbf16, #tpu.memory_space<vmem>>, vector<64x64xbf16>
    %cst_7 = arith.constant dense<0.000000e+00> : vector<16x64xf32>
    %9 = tpu.matmul %7, %8, %cst_7 {dimension_numbers = #tpu.dot_dimension_numbers<[1], [0], [0], [1], [0, 0, 1, 1], [], []>} : vector<16x64xbf16>, vector<64x64xbf16>, vector<16x64xf32> -> vector<16x64xf32>
    %c0_8 = arith.constant 0 : index
    %c0_9 = arith.constant 0 : index
    %10 = vector.load %arg5[%c0_8, %c0_9] : memref<1x64xf32, #tpu.memory_space<vmem>>, vector<1x64xf32>
    %11 = vector.broadcast %10 : vector<1x64xf32> to vector<16x64xf32>
    %12 = arith.addf %9, %11 : vector<16x64xf32>
    %13 = arith.truncf %12 : vector<16x64xf32> to vector<16x64xbf16>
    %14 = math.tanh %13 : vector<16x64xbf16>
    %c0_10 = arith.constant 0 : index
    %c0_11 = arith.constant 0 : index
    %15 = vector.load %arg6[%c0_10, %c0_11] : memref<64x64xbf16, #tpu.memory_space<vmem>>, vector<64x64xbf16>
    %cst_12 = arith.constant dense<0.000000e+00> : vector<16x64xf32>
    %16 = tpu.matmul %14, %15, %cst_12 {dimension_numbers = #tpu.dot_dimension_numbers<[1], [0], [0], [1], [0, 0, 1, 1], [], []>} : vector<16x64xbf16>, vector<64x64xbf16>, vector<16x64xf32> -> vector<16x64xf32>
    %c0_13 = arith.constant 0 : index
    %c0_14 = arith.constant 0 : index
    %17 = vector.load %arg7[%c0_13, %c0_14] : memref<1x64xf32, #tpu.memory_space<vmem>>, vector<1x64xf32>
    %18 = vector.broadcast %17 : vector<1x64xf32> to vector<16x64xf32>
    %19 = arith.addf %16, %18 : vector<16x64xf32>
    %20 = arith.truncf %19 : vector<16x64xf32> to vector<16x64xbf16>
    %21 = math.tanh %20 : vector<16x64xbf16>
    %c0_15 = arith.constant 0 : index
    %c0_16 = arith.constant 0 : index
    %22 = vector.load %arg8[%c0_15, %c0_16] : memref<64x64xbf16, #tpu.memory_space<vmem>>, vector<64x64xbf16>
    %cst_17 = arith.constant dense<0.000000e+00> : vector<16x64xf32>
    %23 = tpu.matmul %21, %22, %cst_17 {dimension_numbers = #tpu.dot_dimension_numbers<[1], [0], [0], [1], [0, 0, 1, 1], [], []>} : vector<16x64xbf16>, vector<64x64xbf16>, vector<16x64xf32> -> vector<16x64xf32>
    %c0_18 = arith.constant 0 : index
    %c0_19 = arith.constant 0 : index
    %24 = vector.load %arg9[%c0_18, %c0_19] : memref<1x64xf32, #tpu.memory_space<vmem>>, vector<1x64xf32>
    %25 = vector.broadcast %24 : vector<1x64xf32> to vector<16x64xf32>
    %26 = arith.addf %23, %25 : vector<16x64xf32>
    %27 = arith.truncf %26 : vector<16x64xf32> to vector<16x64xbf16>
    %28 = math.tanh %27 : vector<16x64xbf16>
    %c0_20 = arith.constant 0 : index
    %c0_21 = arith.constant 0 : index
    %29 = vector.load %arg10[%c0_20, %c0_21] : memref<64x64xbf16, #tpu.memory_space<vmem>>, vector<64x64xbf16>
    %cst_22 = arith.constant dense<0.000000e+00> : vector<16x64xf32>
    %30 = tpu.matmul %28, %29, %cst_22 {dimension_numbers = #tpu.dot_dimension_numbers<[1], [0], [0], [1], [0, 0, 1, 1], [], []>} : vector<16x64xbf16>, vector<64x64xbf16>, vector<16x64xf32> -> vector<16x64xf32>
    %c0_23 = arith.constant 0 : index
    %c0_24 = arith.constant 0 : index
    %31 = vector.load %arg11[%c0_23, %c0_24] : memref<1x64xf32, #tpu.memory_space<vmem>>, vector<1x64xf32>
    %32 = vector.broadcast %31 : vector<1x64xf32> to vector<16x64xf32>
    %33 = arith.addf %30, %32 : vector<16x64xf32>
    %34 = arith.truncf %33 : vector<16x64xf32> to vector<16x64xbf16>
    %35 = math.tanh %34 : vector<16x64xbf16>
    %c0_25 = arith.constant 0 : index
    %c0_26 = arith.constant 0 : index
    %36 = vector.load %arg12[%c0_25, %c0_26] : memref<64x64xbf16, #tpu.memory_space<vmem>>, vector<64x64xbf16>
    %cst_27 = arith.constant dense<0.000000e+00> : vector<16x64xf32>
    %37 = tpu.matmul %35, %36, %cst_27 {dimension_numbers = #tpu.dot_dimension_numbers<[1], [0], [0], [1], [0, 0, 1, 1], [], []>} : vector<16x64xbf16>, vector<64x64xbf16>, vector<16x64xf32> -> vector<16x64xf32>
    %c0_28 = arith.constant 0 : index
    %c0_29 = arith.constant 0 : index
    %38 = vector.load %arg13[%c0_28, %c0_29] : memref<1x64xf32, #tpu.memory_space<vmem>>, vector<1x64xf32>
    %39 = vector.broadcast %38 : vector<1x64xf32> to vector<16x64xf32>
    %40 = arith.addf %37, %39 : vector<16x64xf32>
    %41 = arith.truncf %40 : vector<16x64xf32> to vector<16x64xbf16>
    %42 = math.tanh %41 : vector<16x64xbf16>
    %c0_30 = arith.constant 0 : index
    %c0_31 = arith.constant 0 : index
    %43 = vector.load %arg14[%c0_30, %c0_31] : memref<64x16xbf16, #tpu.memory_space<vmem>>, vector<64x16xbf16>
    %cst_32 = arith.constant dense<0.000000e+00> : vector<16x16xf32>
    %44 = tpu.matmul %42, %43, %cst_32 {dimension_numbers = #tpu.dot_dimension_numbers<[1], [0], [0], [1], [0, 0, 1, 1], [], []>} : vector<16x64xbf16>, vector<64x16xbf16>, vector<16x16xf32> -> vector<16x16xf32>
    %c0_33 = arith.constant 0 : index
    %c0_34 = arith.constant 0 : index
    %45 = vector.load %arg15[%c0_33, %c0_34] : memref<1x16xf32, #tpu.memory_space<vmem>>, vector<1x16xf32>
    %46 = vector.broadcast %45 : vector<1x16xf32> to vector<16x16xf32>
    %47 = arith.addf %44, %46 : vector<16x16xf32>
    %c0_35 = arith.constant 0 : index
    %c0_36 = arith.constant 0 : index
    %48 = vector.load %arg16[%c0_35, %c0_36] : memref<16x16xf32, #tpu.memory_space<vmem>>, vector<16x16xf32>
    tpu.vector_store %arg16[%c0_35, %c0_36], %47 {strides = array<i32>} : memref<16x16xf32, #tpu.memory_space<vmem>>, vector<16x16xf32>,
    return
  }
  func.func @transform_0(%arg0: i32) -> (i32, i32) {
    %c0_i32 = arith.constant 0 : i32
    %c0_i32_0 = arith.constant 0 : i32
    return %arg0, %c0_i32 : i32, i32
  }
  func.func @transform_1(%arg0: i32) -> (i32, i32) {
    %c0_i32 = arith.constant 0 : i32
    %c0_i32_0 = arith.constant 0 : i32
    %c0_i32_1 = arith.constant 0 : i32
    return %c0_i32, %c0_i32_0 : i32, i32
  }
  func.func @transform_2(%arg0: i32) -> (i32, i32) {
    %c0_i32 = arith.constant 0 : i32
    %c0_i32_0 = arith.constant 0 : i32
    %c0_i32_1 = arith.constant 0 : i32
    return %c0_i32, %c0_i32_0 : i32, i32
  }
  func.func @transform_3(%arg0: i32) -> (i32, i32) {
    %c0_i32 = arith.constant 0 : i32
    %c0_i32_0 = arith.constant 0 : i32
    %c0_i32_1 = arith.constant 0 : i32
    return %c0_i32, %c0_i32_0 : i32, i32
  }
  func.func @transform_4(%arg0: i32) -> (i32, i32) {
    %c0_i32 = arith.constant 0 : i32
    %c0_i32_0 = arith.constant 0 : i32
    %c0_i32_1 = arith.constant 0 : i32
    return %c0_i32, %c0_i32_0 : i32, i32
  }
  func.func @transform_5(%arg0: i32) -> (i32, i32) {
    %c0_i32 = arith.constant 0 : i32
    %c0_i32_0 = arith.constant 0 : i32
    %c0_i32_1 = arith.constant 0 : i32
    return %c0_i32, %c0_i32_0 : i32, i32
  }
  func.func @transform_6(%arg0: i32) -> (i32, i32) {
    %c0_i32 = arith.constant 0 : i32
    %c0_i32_0 = arith.constant 0 : i32
    %c0_i32_1 = arith.constant 0 : i32
    return %c0_i32, %c0_i32_0 : i32, i32
  }
  func.func @transform_7(%arg0: i32) -> (i32, i32) {
    %c0_i32 = arith.constant 0 : i32
    %c0_i32_0 = arith.constant 0 : i32
    %c0_i32_1 = arith.constant 0 : i32
    return %c0_i32, %c0_i32_0 : i32, i32
  }
  func.func @transform_8(%arg0: i32) -> (i32, i32) {
    %c0_i32 = arith.constant 0 : i32
    %c0_i32_0 = arith.constant 0 : i32
    %c0_i32_1 = arith.constant 0 : i32
    return %c0_i32, %c0_i32_0 : i32, i32
  }
  func.func @transform_9(%arg0: i32) -> (i32, i32) {
    %c0_i32 = arith.constant 0 : i32
    %c0_i32_0 = arith.constant 0 : i32
    %c0_i32_1 = arith.constant 0 : i32
    return %c0_i32, %c0_i32_0 : i32, i32
  }
  func.func @transform_10(%arg0: i32) -> (i32, i32) {
    %c0_i32 = arith.constant 0 : i32
    %c0_i32_0 = arith.constant 0 : i32
    %c0_i32_1 = arith.constant 0 : i32
    return %c0_i32, %c0_i32_0 : i32, i32
  }
  func.func @transform_11(%arg0: i32) -> (i32, i32) {
    %c0_i32 = arith.constant 0 : i32
    %c0_i32_0 = arith.constant 0 : i32
    %c0_i32_1 = arith.constant 0 : i32
    return %c0_i32, %c0_i32_0 : i32, i32
  }
  func.func @transform_12(%arg0: i32) -> (i32, i32) {
    %c0_i32 = arith.constant 0 : i32
    %c0_i32_0 = arith.constant 0 : i32
    %c0_i32_1 = arith.constant 0 : i32
    return %c0_i32, %c0_i32_0 : i32, i32
  }
  func.func @transform_13(%arg0: i32) -> (i32, i32) {
    %c0_i32 = arith.constant 0 : i32
    %c0_i32_0 = arith.constant 0 : i32
    %c0_i32_1 = arith.constant 0 : i32
    return %c0_i32, %c0_i32_0 : i32, i32
  }
  func.func @transform_14(%arg0: i32) -> (i32, i32) {
    %c0_i32 = arith.constant 0 : i32
    %c0_i32_0 = arith.constant 0 : i32
    %c0_i32_1 = arith.constant 0 : i32
    return %c0_i32, %c0_i32_0 : i32, i32
  }
  func.func @transform_15(%arg0: i32) -> (i32, i32) {
    %c0_i32 = arith.constant 0 : i32
    %c0_i32_0 = arith.constant 0 : i32
    return %arg0, %c0_i32 : i32, i32
  }
}

</mosaic_0001>

<bundles_post_ra>
// kernel: tpu_custom_call.1
= control target key start
LH: loop header
LB: loop body
LE: loop exit
PB: predicated region body
PF: predicated region fallthrough
CT: control target
= control target key end

     0   :  { %20 = vsyncpa [#allocation3], 0  ;;  %s1462_s0 = inlined_call_operand.hbm [shape: bf16[16,32], index: 0, kind: input, shape index: {}]   ;;  %s1463_s1 = inlined_call_operand.hbm [shape: bf16[32,64], index: 1, kind: input, shape index: {}]   ;;  %s1464_s2 = inlined_call_operand.vmem [shape: f32[1,64], index: 2, kind: input, shape index: {}]   ;;  %s1465_s3 = inlined_call_operand.vmem [shape: bf16[64,64], index: 3, kind: input, shape index: {}]   ;;  %s1466_s4 = inlined_call_operand.vmem [shape: f32[1,64], index: 4, kind: input, shape index: {}]   ;;  %s1467_s5 = inlined_call_operand.hbm [shape: bf16[64,64], index: 5, kind: input, shape index: {}]   ;;  %s1468_s6 = inlined_call_operand.hbm [shape: f32[1,64], index: 6, kind: input, shape index: {}]   ;;  %s1469_s7 = inlined_call_operand.vmem [shape: bf16[64,64], index: 7, kind: input, shape index: {}]   ;;  %s1470_s8 = inlined_call_operand.hbm [shape: f32[1,64], index: 8, kind: input, shape index: {}]   ;;  %s1471_s9 = inlined_call_operand.hbm [shape: bf16[64,64], index: 9, kind: input, shape index: {}]   ;;  %s1472_s10 = inlined_call_operand.vmem [shape: f32[1,64], index: 10, kind: input, shape index: {}]   ;;  %s1473_s11 = inlined_call_operand.hbm [shape: bf16[64,64], index: 11, kind: input, shape index: {}]   ;;  %s1474_s12 = inlined_call_operand.vmem [shape: f32[1,64], index: 12, kind: input, shape index: {}]   ;;  %s1475_s13 = inlined_call_operand.vmem [shape: bf16[64,16], index: 13, kind: input, shape index: {}]   ;;  %s1476_s14 = inlined_call_operand.vmem [shape: f32[1,16], index: 14, kind: input, shape index: {}]   ;;  %s1477_s15 = inlined_call_operand.hbm [shape: f32[16,16], index: 15, kind: output, shape index: {}]  }
   0x1   :  { %21 = vsyncpa [#allocation6], 0 }
   0x2   :  { %22 = vsyncpa [#allocation9], 0 }
   0x3   :  { %23 = vsyncpa [#allocation12], 0 }
   0x4   :  { %24 = vsyncpa [#allocation4], 0  ;;  %s1145_s18 = smov [#allocation5]   ;;  %s1146_s20 = smov [#allocation8]  }
   0x5   :  { %s42_s19 = sshll.u32 %s1145_s18, 4  ;;  %s73_s21 = sshll.u32 %s1146_s20, 4  ;;  %s43_s19 = int_to_ptr.vmem [resolvable:$true] %s42_s19  ;;  %s1239_s21 = int_to_ptr.vmem [resolvable:$true] %s73_s21 }
   0x6   :  { %s959_s24 = scalar_lea.hbm %s1463_s1, 256 }
   0x7   :  { %p960_p0 = scmp.ne.s32.totalorder %s1463_s1, %s959_s24  ;;  %p963_p1 = scmp.lt.u32.totalorder %s959_s24, %s1463_s1 }
   0x9   :  { %p965_p2 = pnand %p963_p1, %p960_p0 }
   0xb   :  { %968 = shalt.err (!%p965_p2)
}
   0xc   :  { %s969_s29 = scalar_lea.vmem %s43_s19, 256  ;;  %p974_p4 = scmp.lt.s32.totalorder %s43_s19, %s43_s19 }
   0xd   :  { %p970_p3 = scmp.ne.s32.totalorder %s43_s19, %s969_s29  ;;  %p975_p5 = scmp.lt.s32.totalorder %s969_s29, %s969_s29 }
   0xf   :  { %p976_p6 = por %p975_p5, %p974_p4 }
  0x11   :  { %p977_p7 = pnand %p976_p6, %p970_p3 }
  0x13   :  { %980 = shalt.err (!%p977_p7)
}
  0x14   :  { %s1147_s30 = smov 64   ;;  %s1148_s16 = smov 4  }
  0x15   :  { %48 = dma.hbm_to_vmem [thread:$0]  %s1463_s1, 256, %s43_s19, [#allocation6], %s1147_s30, %s1147_s30, %s1148_s16  }
  0x16   :  { %s981_s23 = scalar_lea.hbm %s1468_s6, 16 }
  0x17   :  { %p982_p8 = scmp.ne.s32.totalorder %s1468_s6, %s981_s23  ;;  %p985_p9 = scmp.lt.u32.totalorder %s981_s23, %s1468_s6 }
  0x19   :  { %p987_p10 = pnand %p985_p9, %p982_p8 }
  0x1b   :  { %990 = shalt.err (!%p987_p10)
}
  0x1c   :  { %s991_s28 = scalar_lea.vmem %s1239_s21, 16  ;;  %s995_s1 = scalar_lea.vmem %s1239_s21, 32 }
  0x1d   :  { %p992_p11 = scmp.ne.s32.totalorder %s1239_s21, %s991_s28  ;;  %p996_p12 = scmp.lt.s32.totalorder %s1239_s21, %s1239_s21 }
  0x1e   :  { %p997_p13 = scmp.lt.s32.totalorder %s995_s1, %s991_s28 }
  0x20   :  { %p998_p0 = por %p997_p13, %p996_p12 }
  0x22   :  { %p999_p1 = pnand %p998_p0, %p992_p11 }
  0x24   :  { %1002 = shalt.err (!%p999_p1)
}
  0x25   :  { %76 = dma.hbm_to_vmem [thread:$0]  %s1468_s6, 16, %s1239_s21, [#allocation9]  }
  0x26   :  { %s1149_s17 = smov [#allocation11]   ;;  %s1150_s20 = smov [#allocation2]  }
  0x27   :  { %s94_s18 = sshll.u32 %s1149_s17, 4  ;;  %s30_s22 = sshll.u32 %s1150_s20, 4  ;;  %s95_s18 = int_to_ptr.vmem [resolvable:$true] %s94_s18  ;;  %s1274_s22 = int_to_ptr.vmem [resolvable:$true] %s30_s22 }
  0x28   :  { %s1003_s25 = scalar_lea.hbm %s1471_s9, 512 }
  0x29   :  { %p1004_p2 = scmp.ne.s32.totalorder %s1471_s9, %s1003_s25  ;;  %p1007_p3 = scmp.lt.u32.totalorder %s1003_s25, %s1471_s9 }
  0x2b   :  { %p1009_p4 = pnand %p1007_p3, %p1004_p2 }
  0x2d   :  { %1012 = shalt.err (!%p1009_p4)
}
  0x2e   :  { %s1013_s6 = scalar_lea.vmem %s95_s18, 512  ;;  %p1018_p6 = scmp.lt.s32.totalorder %s95_s18, %s95_s18 }
  0x2f   :  { %p1014_p5 = scmp.ne.s32.totalorder %s95_s18, %s1013_s6  ;;  %p1019_p7 = scmp.lt.s32.totalorder %s1013_s6, %s1013_s6 }
  0x31   :  { %p1020_p8 = por %p1019_p7, %p1018_p6 }
  0x33   :  { %p1021_p9 = pnand %p1020_p8, %p1014_p5 }
  0x35   :  { %1024 = shalt.err (!%p1021_p9)
}
  0x36   :  { %100 = dma.hbm_to_vmem [thread:$0]  %s1471_s9, 512, %s95_s18, [#allocation12], %s1147_s30, %s1147_s30, %s1148_s16  }
  0x37   :  { %s1025_s20 = scalar_lea.hbm %s1462_s0, 128 }
  0x38   :  { %p1026_p10 = scmp.ne.s32.totalorder %s1462_s0, %s1025_s20  ;;  %p1029_p11 = scmp.lt.u32.totalorder %s1025_s20, %s1462_s0 }
  0x3a   :  { %p1031_p12 = pnand %p1029_p11, %p1026_p10 }
  0x3c   :  { %1034 = shalt.err (!%p1031_p12)
}
  0x3d   :  { %s1035_s27 = scalar_lea.vmem %s1274_s22, 128  ;;  %p1040_p0 = scmp.lt.s32.totalorder %s1274_s22, %s1274_s22 }
  0x3e   :  { %p1036_p13 = scmp.ne.s32.totalorder %s1274_s22, %s1035_s27  ;;  %p1041_p1 = scmp.lt.s32.totalorder %s1035_s27, %s1035_s27 }
  0x40   :  { %p1042_p2 = por %p1041_p1, %p1040_p0 }
  0x42   :  { %p1043_p3 = pnand %p1042_p2, %p1036_p13 }
  0x44   :  { %1046 = shalt.err (!%p1043_p3)
}
  0x45   :  { %36 = dma.hbm_to_vmem [thread:$0]  %s1462_s0, 128, %s1274_s22, [#allocation3], %s1147_s30, %s1147_s30, %s1148_s16  }
  0x46   :  { %s1151_s28 = smov [#allocation7]   ;;  %s1152_s6 = smov [#allocation10]  }
  0x47   :  { %s60_s1 = sshll.u32 %s1151_s28, 4  ;;  %s85_s21 = sshll.u32 %s1152_s6, 4  ;;  %s61_s1 = int_to_ptr.vmem [resolvable:$true] %s60_s1  ;;  %s86_s21 = int_to_ptr.vmem [resolvable:$true] %s85_s21 }
  0x48   :  { %s1047_s17 = scalar_lea.hbm %s1467_s5, 512 }
  0x49   :  { %p1048_p4 = scmp.ne.s32.totalorder %s1467_s5, %s1047_s17  ;;  %p1051_p5 = scmp.lt.u32.totalorder %s1047_s17, %s1467_s5 }
  0x4b   :  { %p1053_p6 = pnand %p1051_p5, %p1048_p4 }
  0x4d   :  { %1056 = shalt.err (!%p1053_p6)
}
  0x4e   :  { %s1057_s0 = scalar_lea.vmem %s61_s1, 512  ;;  %p1062_p8 = scmp.lt.s32.totalorder %s61_s1, %s61_s1 }
  0x4f   :  { %p1058_p7 = scmp.ne.s32.totalorder %s61_s1, %s1057_s0  ;;  %p1063_p9 = scmp.lt.s32.totalorder %s1057_s0, %s1057_s0 }
  0x51   :  { %p1064_p10 = por %p1063_p9, %p1062_p8 }
  0x53   :  { %p1065_p11 = pnand %p1064_p10, %p1058_p7 }
  0x55   :  { %1068 = shalt.err (!%p1065_p11)
}
  0x56   :  { %66 = dma.hbm_to_vmem [thread:$0]  %s1467_s5, 512, %s61_s1, [#allocation6], %s1147_s30, %s1147_s30, %s1148_s16  }
  0x57   :  { %s1069_s18 = scalar_lea.hbm %s1470_s8, 16 }
  0x58   :  { %p1070_p12 = scmp.ne.s32.totalorder %s1470_s8, %s1069_s18  ;;  %p1073_p13 = scmp.lt.u32.totalorder %s1069_s18, %s1470_s8 }
  0x5a   :  { %p1075_p0 = pnand %p1073_p13, %p1070_p12 }
  0x5c   :  { %1078 = shalt.err (!%p1075_p0)
}
  0x5d   :  { %s1079_s17 = scalar_lea.vmem %s86_s21, 16  ;;  %s1083_s20 = scalar_lea.vmem %s86_s21, 32 }
  0x5e   :  { %p1080_p1 = scmp.ne.s32.totalorder %s86_s21, %s1079_s17  ;;  %p1084_p2 = scmp.lt.s32.totalorder %s86_s21, %s86_s21 }
  0x5f   :  { %p1085_p3 = scmp.lt.s32.totalorder %s1083_s20, %s1079_s17 }
  0x61   :  { %p1086_p4 = por %p1085_p3, %p1084_p2 }
  0x63   :  { %p1087_p5 = pnand %p1086_p4, %p1080_p1 }
  0x65   :  { %1090 = shalt.err (!%p1087_p5)
}
  0x66   :  { %88 = dma.hbm_to_vmem [thread:$0]  %s1470_s8, 16, %s86_s21, [#allocation9]  }
  0x67   :  { %s1153_s23 = smov [#allocation13]   ;;  %s1091_s22 = scalar_lea.hbm %s1473_s11, 512 }
  0x68   :  { %s108_s24 = sshll.u32 %s1153_s23, 4  ;;  %p1092_p6 = scmp.ne.s32.totalorder %s1473_s11, %s1091_s22  ;;  %s109_s24 = int_to_ptr.vmem [resolvable:$true] %s108_s24 }
  0x69   :  { %p1095_p7 = scmp.lt.u32.totalorder %s1091_s22, %s1473_s11 }
  0x6b   :  { %p1097_p8 = pnand %p1095_p7, %p1092_p6 }
  0x6d   :  { %1100 = shalt.err (!%p1097_p8)
}
  0x6e   :  { %s1101_s28 = scalar_lea.vmem %s109_s24, 512  ;;  %p1106_p10 = scmp.lt.s32.totalorder %s109_s24, %s109_s24 }
  0x6f   :  { %p1102_p9 = scmp.ne.s32.totalorder %s109_s24, %s1101_s28  ;;  %p1107_p11 = scmp.lt.s32.totalorder %s1101_s28, %s1101_s28 }
  0x71   :  { %p1108_p12 = por %p1107_p11, %p1106_p10 }
  0x73   :  { %p1109_p13 = pnand %p1108_p12, %p1102_p9 }
  0x75   :  { %1112 = shalt.err (!%p1109_p13)
}
  0x76   :  { %114 = dma.hbm_to_vmem [thread:$0]  %s1473_s11, 512, %s109_s24, [#allocation12], %s1147_s30, %s1147_s30, %s1148_s16  }
  0x77   :  { %1135 = dma.done.wait [#allocation3], 128  }
  0x78   :  { %1136 = vsyncadd [#allocation3], 4294967168 }
  0x79   :  { %1137 = dma.done.wait [#allocation6], 768  }
  0x7a   :  { %1138 = vsyncadd [#allocation6], 4294966528 }
  0x7b   :  { %1139 = dma.done.wait [#allocation9], 32  }
  0x7c   :  { %1140 = vsyncadd [#allocation9], 4294967264 }
  0x7d   :  { %1141 = dma.done.wait [#allocation12], 1024  }
  0x7e   :  { %1142 = vsyncadd [#allocation12], 4294966272  ;;  %v1154_v0 = vmov 0.0   ;;  %vm1155_vm0 = vmmov 0   ;;  %v920_v1 = vld [vmem:[#allocation5] sm:$0xff]   ;;  %v921_v2 = vld [vmem:[#allocation5 + $0x8] sm:$0xff]  }
  0x7f   :  { %826 = vmatprep.subr.bf16.mxu0 %v1154_v0  ;;  %830 = vmatprep.mubr.msk.bf16.mxu0 %vm1155_vm0, %v1154_v0  ;;  %v922_v3 = vld [vmem:[#allocation2] sm:$0xff]   ;;  %vm173_vm1 = vcmask 261120   ;;  %v924_v5 = vld [vmem:[%s1465_s3 + $0x8] sm:$0xff]   ;;  %v925_v6 = vld [vmem:[%s1465_s3 + $0x10] sm:$0xff]   ;;  %vm259_vm2 = vcmask 523264   ;;  %s1156_s17 = smov [#allocation14]  }
  0x80   :  { %834 = vmatprep.subr.bf16.mxu1 %v1154_v0  ;;  %842 = vmatprep.mubr.msk.bf16.mxu1 %vm1155_vm0, %v1154_v0  ;;  %v923_v4 = vld [vmem:[%s1465_s3] sm:$0xff]   ;;  %v926_v7 = vld [vmem:[%s1465_s3 + $0x18] sm:$0xff]   ;;  %v929_v19 = vld [vmem:[#allocation7 + $0x10] sm:$0xff]   ;;  %s737_s20 = sshll.u32 %s1156_s17, 4  ;;  %vm729_vm3 = vcmask 130048   ;;  %s738_s20 = int_to_ptr.vmem [resolvable:$true] %s737_s20 }
  0x81   :  { %827 = vmatpush3.bf16.msra.mxu0 %v920_v1  ;;  %835 = vmatpush3.bf16.msra.mxu1 %v923_v4  ;;  %v752_v8 = vld [vmem:[%s1464_s2] ss:$0 sm:$0xff]  ;;  %v927_v17 = vld [vmem:[#allocation7] sm:$0xff]   ;;  %v930_v20 = vld [vmem:[#allocation7 + $0x18] sm:$0xff]   ;;  %p1118_p1 = scmp.lt.s32.totalorder %s738_s20, %s738_s20 }
  0x82   :  { %828 = vmatprep.subr.bf16.mxu0 %v1154_v0  ;;  %836 = vmatprep.subr.bf16.mxu1 %v1154_v0  ;;  %v928_v18 = vld [vmem:[#allocation7 + $0x8] sm:$0xff]   ;;  %v932_v31 = vld [vmem:[%s1469_s7 + $0x8] sm:$0xff]   ;;  %v933_v32 = vld [vmem:[%s1469_s7 + $0x10] sm:$0xff]  }
  0x83   :  { %v757_v21 = vld [vmem:[%s1466_s4] ss:$0 sm:$0xff]  ;;  %v934_v33 = vld [vmem:[%s1469_s7 + $0x18] sm:$0xff]   ;;  %v936_v44 = vld [vmem:[#allocation11 + $0x8] sm:$0xff]  }
  0x84   :  { %v931_v30 = vld [vmem:[%s1469_s7] sm:$0xff]   ;;  %v763_v34 = vld [vmem:[#allocation8] ss:$0 sm:$0xff]  ;;  %v937_v45 = vld [vmem:[#allocation11 + $0x10] sm:$0xff]  }
  0x85   :  { %829 = vmatpush3.bf16.msra.mxu0 %v921_v2  ;;  %837 = vmatpush3.bf16.msra.mxu1 %v924_v5  ;;  %v935_v43 = vld [vmem:[#allocation11] sm:$0xff]   ;;  %v938_v46 = vld [vmem:[#allocation11 + $0x18] sm:$0xff]   ;;  %v940_v57 = vld [vmem:[#allocation13 + $0x8] sm:$0xff]  }
  0x86   :  { %846 = vmatprep.subr.bf16.mxu0 %v1154_v0  ;;  %838 = vmatprep.subr.bf16.mxu1 %v1154_v0  ;;  %v769_v47 = vld [vmem:[#allocation10] ss:$0 sm:$0xff]  ;;  %v939_v56 = vld [vmem:[#allocation13] sm:$0xff]   ;;  %v941_v58 = vld [vmem:[#allocation13 + $0x10] sm:$0xff]  }
  0x87   :  { %v942_v59 = vld [vmem:[#allocation13 + $0x18] sm:$0xff]   ;;  %v775_v60 = vld [vmem:[%s1472_s10] ss:$0 sm:$0xff] }
  0x88   :  { %831 = vmatmul.mubr.msk.bf16.vlgmr.msra.gmra.mrb[0].mxu0 %vm173_vm1, %v922_v3 }
  0x89   :  { %854 = vmatprep.mubr.msk.bf16.mxu0 %vm1155_vm0, %v1154_v0  ;;  %839 = vmatpush3.bf16.msra.mxu1 %v925_v6  ;;  %v943_v6 = vld [vmem:[%s1475_s13] sm:$0xff]  }
  0x8a   :  { %840 = vmatprep.subr.bf16.mxu1 %v1154_v0  ;;  %847 = vmatpush3.bf16.msra.mxu0 %v927_v17 }
  0x8b   :  { %848 = vmatprep.subr.bf16.mxu0 %v1154_v0 }
  0x8d   :  { %841 = vmatpush3.bf16.msra.mxu1 %v926_v7  ;;  %v944_v7 = vld [vmem:[%s1475_s13 + $0x8] sm:$0xff]  }
  0x8e   :  { %858 = vmatprep.subr.bf16.mxu1 %v1154_v0  ;;  %849 = vmatpush3.bf16.msra.mxu0 %v928_v18 }
  0x8f   :  { %850 = vmatprep.subr.bf16.mxu0 %v1154_v0 }
  0x92   :  { %851 = vmatpush3.bf16.msra.mxu0 %v929_v19 }
  0x93   :  { %852 = vmatprep.subr.bf16.mxu0 %v1154_v0 }
  0x96   :  { %853 = vmatpush3.bf16.msra.mxu0 %v930_v20 }
  0x97   :  { %870 = vmatprep.subr.bf16.mxu0 %v1154_v0 }
 0x15b   :  { %v211_v9 = vpop.f32.mrb[0].mxu0 }
 0x15c   :  { %v832_v10 = vpop.f32.mrb[1].mxu0  ;;  %v212_v12 = vadd.f32 %v752_v8, %v211_v9  ;;  %v946_v9 = vld [vmem:[%s1475_s13 + $0x18] sm:$0xff]  }
 0x15d   :  { %v214_v11 = vpop.f32.mrb[2].mxu0  ;;  %v781_v10 = vld [vmem:[%s1474_s12] ss:$0 sm:$0xff]  ;;  %s1113_s12 = scalar_lea.vmem %s738_s20, 256 }
 0x15e   :  { %v215_v13 = vadd.f32 %v752_v8, %v214_v11  ;;  %v833_v14 = vpop.f32.mrb[3].mxu0  ;;  %v945_v8 = vld [vmem:[%s1475_s13 + $0x10] sm:$0xff]   ;;  %p1114_p0 = scmp.ne.s32.totalorder %s738_s20, %s1113_s12  ;;  %p1119_p2 = scmp.lt.s32.totalorder %s1113_s12, %s1113_s12 }
 0x160   :  { %v218_v15 = vpack.c.bf16 %v215_v13, %v212_v12  ;;  %p1120_p3 = por %p1119_p2, %p1118_p1 }
 0x162   :  { %947 = vtanh.bf16 %v218_v15  ;;  %p1121_p4 = pnand %p1120_p3, %p1114_p0 }
 0x16d   :  { %v948_v16 = vpop.eup %947 }
 0x16e   :  { %843 = vmatmul.mubr.msk.bf16.vlgmr.msra.gmra.mrb[0].mxu1 %vm259_vm2, %v948_v16 }
 0x16f   :  { %866 = vmatprep.mubr.msk.bf16.mxu1 %vm1155_vm0, %v1154_v0  ;;  %859 = vmatpush3.bf16.msra.mxu1 %v931_v30 }
 0x170   :  { %860 = vmatprep.subr.bf16.mxu1 %v1154_v0 }
 0x173   :  { %861 = vmatpush3.bf16.msra.mxu1 %v932_v31 }
 0x174   :  { %862 = vmatprep.subr.bf16.mxu1 %v1154_v0 }
 0x177   :  { %863 = vmatpush3.bf16.msra.mxu1 %v933_v32 }
 0x178   :  { %864 = vmatprep.subr.bf16.mxu1 %v1154_v0 }
 0x17b   :  { %865 = vmatpush3.bf16.msra.mxu1 %v934_v33 }
 0x17c   :  { %882 = vmatprep.subr.bf16.mxu1 %v1154_v0 }
 0x241   :  { %v297_v22 = vpop.f32.mrb[0].mxu1 }
 0x242   :  { %v844_v23 = vpop.f32.mrb[1].mxu1  ;;  %v298_v25 = vadd.f32 %v757_v21, %v297_v22 }
 0x243   :  { %v300_v24 = vpop.f32.mrb[2].mxu1 }
 0x244   :  { %v301_v26 = vadd.f32 %v757_v21, %v300_v24  ;;  %v845_v27 = vpop.f32.mrb[3].mxu1 }
 0x246   :  { %v304_v28 = vpack.c.bf16 %v301_v26, %v298_v25 }
 0x248   :  { %949 = vtanh.bf16 %v304_v28 }
 0x253   :  { %v950_v29 = vpop.eup %949 }
 0x254   :  { %855 = vmatmul.mubr.msk.bf16.vlgmr.msra.gmra.mrb[4].mxu0 %vm259_vm2, %v950_v29 }
 0x255   :  { %878 = vmatprep.mubr.msk.bf16.mxu0 %vm1155_vm0, %v1154_v0  ;;  %871 = vmatpush3.bf16.msra.mxu0 %v935_v43 }
 0x256   :  { %872 = vmatprep.subr.bf16.mxu0 %v1154_v0 }
 0x259   :  { %873 = vmatpush3.bf16.msra.mxu0 %v936_v44 }
 0x25a   :  { %874 = vmatprep.subr.bf16.mxu0 %v1154_v0 }
 0x25d   :  { %875 = vmatpush3.bf16.msra.mxu0 %v937_v45 }
 0x25e   :  { %876 = vmatprep.subr.bf16.mxu0 %v1154_v0 }
 0x261   :  { %877 = vmatpush3.bf16.msra.mxu0 %v938_v46 }
 0x262   :  { %894 = vmatprep.subr.bf16.mxu0 %v1154_v0 }
 0x327   :  { %v382_v35 = vpop.f32.mrb[4].mxu0 }
 0x328   :  { %v856_v36 = vpop.f32.mrb[5].mxu0  ;;  %v383_v38 = vadd.f32 %v763_v34, %v382_v35 }
 0x329   :  { %v385_v37 = vpop.f32.mrb[6].mxu0 }
 0x32a   :  { %v386_v39 = vadd.f32 %v763_v34, %v385_v37  ;;  %v857_v40 = vpop.f32.mrb[7].mxu0 }
 0x32c   :  { %v389_v41 = vpack.c.bf16 %v386_v39, %v383_v38 }
 0x32e   :  { %951 = vtanh.bf16 %v389_v41 }
 0x339   :  { %v952_v42 = vpop.eup %951 }
 0x33a   :  { %867 = vmatmul.mubr.msk.bf16.vlgmr.msra.gmra.mrb[4].mxu1 %vm259_vm2, %v952_v42 }
 0x33b   :  { %890 = vmatprep.mubr.msk.bf16.mxu1 %vm1155_vm0, %v1154_v0  ;;  %883 = vmatpush3.bf16.msra.mxu1 %v939_v56 }
 0x33c   :  { %884 = vmatprep.subr.bf16.mxu1 %v1154_v0 }
 0x33f   :  { %885 = vmatpush3.bf16.msra.mxu1 %v940_v57 }
 0x340   :  { %886 = vmatprep.subr.bf16.mxu1 %v1154_v0 }
 0x343   :  { %887 = vmatpush3.bf16.msra.mxu1 %v941_v58 }
 0x344   :  { %888 = vmatprep.subr.bf16.mxu1 %v1154_v0 }
 0x347   :  { %889 = vmatpush3.bf16.msra.mxu1 %v942_v59 }
 0x40d   :  { %v467_v48 = vpop.f32.mrb[4].mxu1 }
 0x40e   :  { %v868_v49 = vpop.f32.mrb[5].mxu1  ;;  %v468_v51 = vadd.f32 %v769_v47, %v467_v48 }
 0x40f   :  { %v470_v50 = vpop.f32.mrb[6].mxu1 }
 0x410   :  { %v471_v52 = vadd.f32 %v769_v47, %v470_v50  ;;  %v869_v53 = vpop.f32.mrb[7].mxu1 }
 0x412   :  { %v474_v54 = vpack.c.bf16 %v471_v52, %v468_v51 }
 0x414   :  { %953 = vtanh.bf16 %v474_v54 }
 0x41f   :  { %v954_v55 = vpop.eup %953 }
 0x420   :  { %879 = vmatmul.mubr.msk.bf16.vlgmr.msra.gmra.mrb[8].mxu0 %vm259_vm2, %v954_v55 }
 0x421   :  { %902 = vmatprep.mubr.msk.bf16.mxu0 %vm1155_vm0, %v1154_v0  ;;  %895 = vmatpush3.bf16.msra.mxu0 %v943_v6 }
 0x422   :  { %896 = vmatprep.subr.bf16.mxu0 %v1154_v0 }
 0x425   :  { %897 = vmatpush3.bf16.msra.mxu0 %v944_v7 }
 0x426   :  { %898 = vmatprep.subr.bf16.mxu0 %v1154_v0 }
 0x429   :  { %899 = vmatpush3.bf16.msra.mxu0 %v945_v8 }
 0x42a   :  { %900 = vmatprep.subr.bf16.mxu0 %v1154_v0  ;;  %v787_v0 = vld [vmem:[%s1476_s14] ss:$0 sm:$0xff] }
 0x42d   :  { %901 = vmatpush3.bf16.msra.mxu0 %v946_v9 }
 0x4f3   :  { %v552_v61 = vpop.f32.mrb[8].mxu0 }
 0x4f4   :  { %v880_v62 = vpop.f32.mrb[9].mxu0  ;;  %v553_v1 = vadd.f32 %v775_v60, %v552_v61 }
 0x4f5   :  { %v555_v63 = vpop.f32.mrb[10].mxu0 }
 0x4f6   :  { %v556_v2 = vadd.f32 %v775_v60, %v555_v63  ;;  %v881_v3 = vpop.f32.mrb[11].mxu0 }
 0x4f8   :  { %v559_v4 = vpack.c.bf16 %v556_v2, %v553_v1 }
 0x4fa   :  { %955 = vtanh.bf16 %v559_v4 }
 0x505   :  { %v956_v5 = vpop.eup %955 }
 0x506   :  { %891 = vmatmul.mubr.msk.bf16.vlgmr.msra.gmra.mrb[8].mxu1 %vm259_vm2, %v956_v5 }
 0x5d9   :  { %v637_v11 = vpop.f32.mrb[8].mxu1 }
 0x5da   :  { %v892_v12 = vpop.f32.mrb[9].mxu1  ;;  %v638_v14 = vadd.f32 %v781_v10, %v637_v11 }
 0x5db   :  { %v640_v13 = vpop.f32.mrb[10].mxu1 }
 0x5dc   :  { %v641_v15 = vadd.f32 %v781_v10, %v640_v13  ;;  %v893_v16 = vpop.f32.mrb[11].mxu1 }
 0x5de   :  { %v644_v17 = vpack.c.bf16 %v641_v15, %v638_v14 }
 0x5e0   :  { %957 = vtanh.bf16 %v644_v17 }
 0x5eb   :  { %v958_v18 = vpop.eup %957 }
 0x5ec   :  { %903 = vmatmul.mubr.msk.bf16.vlgmr.msra.gmra.mrb[12].mxu0 %vm259_vm2, %v958_v18 }
 0x6bf   :  { %v722_v19 = vpop.f32.mrb[12].mxu0 }
 0x6c0   :  { %v723_v20 = vadd.f32 %v787_v0, %v722_v19  ;;  %v904_v21 = vpop.f32.mrb[13].mxu0 }
 0x6c1   :  { %v725_v22 = vpop.f32.mrb[14].mxu0 }
 0x6c2   :  { %730 = vst.msk [vmem:[#allocation14] sm:$0xff] %vm729_vm3, %v723_v20  ;;  %v726_v23 = vadd.f32 %v787_v0, %v725_v22  ;;  %v905_v24 = vpop.f32.mrb[15].mxu0 }
 0x6c4   :  { %731 = vst.msk [vmem:[#allocation14 + $0x8] sm:$0xff] %vm729_vm3, %v726_v23 }
 0x6c5   :  { %1124 = shalt.err (!%p1121_p4)
}
 0x6c6   :  { %s1125_s1 = scalar_lea.hbm %s1477_s15, 256 }
 0x6c7   :  { %p1126_p5 = scmp.ne.s32.totalorder %s1477_s15, %s1125_s1  ;;  %p1129_p6 = scmp.lt.u32.totalorder %s1125_s1, %s1477_s15 }
 0x6c9   :  { %p1131_p7 = pnand %p1129_p6, %p1126_p5 }
 0x6cb   :  { %1134 = shalt.err (!%p1131_p7)
}
 0x6cc   :  { %s1157_s4 = smov 128   ;;  %s1158_s25 = smov 8  }
 0x6cd   :  { %743 = dma.vmem_to_hbm [thread:$0]  %s738_s20, 256, %s1477_s15, [#allocation4], %s1157_s4, %s1157_s4, %s1158_s25  }
 0x6ce   :  { %1143 = dma.done.wait [#allocation4], 256  }
 0x6cf   :  { %1144 = vsyncadd [#allocation4], 4294967040 }
 0x6d0   :  { %747 = vsyncpa [#allocation3], 1 }
 0x6d1   :  { %748 = vsyncpa [#allocation6], 1 }
 0x6d2   :  { %749 = vsyncpa [#allocation9], 1 }
 0x6d3   :  { %750 = vsyncpa [#allocation12], 1 }
 0x6d4   :  { %751 = vsyncpa [#allocation4], 1 }

</bundles_post_ra>
